<compile_context>
chip_gen: v5e
topology: v5e:2x2
jax: 0.10.0
libtpu: 0.0.40
codegen_flags: <defaults>
</compile_context>

<pallas_src>
import jax
import jax.numpy as jnp
from jax.experimental import pallas as pl
from jax.experimental.pallas import tpu as pltpu


def _dma_copy_kernel(x_hbm_ref, o_hbm_ref, sem):
    # Direct HBM->HBM DMA of the whole array. No grid, no VMEM staging, no
    # per-step pipeline overhead; works for any shape/dtype.
    cp = pltpu.make_async_copy(x_hbm_ref, o_hbm_ref, sem)
    cp.start()
    cp.wait()


def _materialized_identity(x):
    """Materialize an explicit copy of x (identity permutation) in a new buffer."""
    return pl.pallas_call(
        _dma_copy_kernel,
        out_shape=jax.ShapeDtypeStruct(x.shape, x.dtype),
        in_specs=[pl.BlockSpec(memory_space=pl.ANY)],
        out_specs=pl.BlockSpec(memory_space=pl.ANY),
        scratch_shapes=[pltpu.SemaphoreType.DMA],
    )(x)


def identity_permuter_forward(x, reverse=False, materialize=False):
    """Identity permuter: forward and reverse are both the identity map.

    Default path elides the kernel entirely (no data movement). Pass
    materialize=True to force an explicit copy into a fresh HBM buffer via a
    single direct HBM->HBM DMA.
    """
    del reverse  # identity permutation is its own inverse
    if not materialize:
        return x
    return _materialized_identity(x)


if __name__ == "__main__":
    key = jax.random.PRNGKey(0)
    B, S = 2, 256  # small [batch, seq] grid of code indices
    x = jax.random.randint(key, (B, S), minval=0, maxval=16384, dtype=jnp.int32)

    # Preferred path: kernel elided — identity is free.
    y_fast = identity_permuter_forward(x, reverse=False)

    # Materialized path: exercises the direct-DMA Pallas kernel once each way.
    y_fwd = identity_permuter_forward(x, reverse=False, materialize=True)
    y_rev = identity_permuter_forward(y_fwd, reverse=True, materialize=True)
    jax.block_until_ready((y_fast, y_fwd, y_rev))

    assert y_fast.shape == x.shape and y_fast.dtype == x.dtype
    assert y_fwd.shape == x.shape and y_fwd.dtype == x.dtype
    assert y_rev.shape == x.shape and y_rev.dtype == x.dtype
    assert bool(jnp.all(y_fast == x)), "elided identity mismatch"
    assert bool(jnp.all(y_fwd == x)), "forward identity mismatch"
    assert bool(jnp.all(y_rev == x)), "reverse identity mismatch"

    print("KERNEL_OK")
</pallas_src>

<mosaic_0001>
module attributes {stable_mosaic.version = 11 : i64} {
  func.func @_dma_copy_kernel(%arg0: memref<2x256xi32, #tpu.memory_space<any>>, %arg1: memref<2x256xi32, #tpu.memory_space<any>>, %arg2: memref<!tpu.dma_semaphore, #tpu.memory_space<semaphore_mem>>) attributes {dimension_semantics = [], scalar_prefetch = 0 : i64, scratch_operands = 1 : i64, tpu.core_type = #tpu.core_type<tc>} {
    tpu.enqueue_dma source(%arg0 : memref<2x256xi32, #tpu.memory_space<any>>) target(%arg1 : memref<2x256xi32, #tpu.memory_space<any>>) target_semaphore(%arg2 : memref<!tpu.dma_semaphore, #tpu.memory_space<semaphore_mem>>)
    tpu.wait_dma2 semaphore(%arg2 : memref<!tpu.dma_semaphore, #tpu.memory_space<semaphore_mem>>) src(%arg0 : memref<2x256xi32, #tpu.memory_space<any>>) dst(%arg1 : memref<2x256xi32, #tpu.memory_space<any>>)
    return
  }
}

</mosaic_0001>

<bundles_post_ra>
// kernel: tpu_custom_call.1
= control target key start
LH: loop header
LB: loop body
LE: loop exit
PB: predicated region body
PF: predicated region fallthrough
CT: control target
= control target key end

     0   :  { %s33_s12 = smov [#allocation2]   ;;  %s34_s13 = smov [#allocation3]   ;;  %s52_s0 = inlined_call_operand.hbm [shape: s32[2,256], index: 0, kind: input, shape index: {}]   ;;  %s53_s1 = inlined_call_operand.hbm [shape: s32[2,256], index: 1, kind: output, shape index: {}]  }
   0x1   :  { %s10_s8 = sshll.u32 %s52_s0, 4  ;;  %s12_s11 = sshll.u32 %s53_s1, 4  ;;  %s11_s8 = int_to_ptr.hbm [resolvable:$true] %s10_s8  ;;  %s13_s11 = int_to_ptr.hbm [resolvable:$true] %s12_s11 }
   0x2   :  { %s35_s14 = smov 0  }
   0x3   :  { %16 = dma.general %s11_s8, 64, %s13_s11, %s33_s12, %s34_s13, [#allocation4], %s35_s14, 0  }
   0x4   :  { %31 = dma.done.wait [#allocation2], 64 }
   0x5   :  { %32 = vsyncadd [#allocation2], 4294967232 }
   0x6   :  { %21 = vsyncmov [#allocation2] }
   0x9   :  { %s22_s15 = vpop.sfrf %21 }
   0xa   :  { %p27_p0 = scmp.ne.s32.totalorder %s22_s15, 0 }
   0xc   :  { %26 = shalt.err (%p27_p0)  }

</bundles_post_ra>
